<compile_context>
chip_gen: v7x
topology: tpu7x:2x2x1
jax: 0.10.0
libtpu: 0.0.40
codegen_flags: <defaults>
</compile_context>

<pallas_src>
import numpy as np
import jax
import jax.numpy as jnp
from jax.experimental import pallas as pl
from jax.experimental.pallas import tpu as pltpu

OBJ_DIM = 256       # stands in for self.obj_dim (4096 in the real model)
HIDDEN_DIM = 256    # node_emb_dim = hidden_dim (256 in the real model) -> fills 256-wide MXU
LOC_IN = 8          # self.location_size
LOC_DIM = 20        # features_dim['location']
NEG_SLOPE = 0.2     # LeakyReLU negative_slope used throughout the module

MAX_ROW_TILE = 512    # node M tile (capped so f32 activations at obj_dim=4096 fit v7x's 64 MiB VMEM)
MAX_PAIR_TILE = 2048  # edge pair tile

_SUBLANE = 8


def _leaky_relu(x):
    return jnp.where(x > 0, x, NEG_SLOPE * x)


def _round_up(x, m):
    return ((x + m - 1) // m) * m


def _choose_tile(n, max_tile, align=_SUBLANE):
    """Largest aligned tile <= max_tile.

    When the problem is big enough to split, aim for >= 2 grid steps so the
    'parallel' axis actually spans both TensorCores on v7x (on single-TC
    v5e/v6e the extra ~0.35us grid step is negligible)."""
    if n <= 2 * align:
        return n                                        # full-extent block (always legal)
    if n <= max_tile:
        return min(_round_up(pl.cdiv(n, 2), align), n)  # ~half -> 2 steps
    return max_tile


def _compiler_params(block_bytes):
    # vmem limit derived from the actual per-step block bytes (double-buffered)
    # plus slack; floored at the common scoped default and kept under v7x's
    # 64 MiB physical VMEM.
    vmem = int(min(60 * 1024 * 1024,
                   max(32 * 1024 * 1024, 2 * block_bytes + 8 * 1024 * 1024)))
    return pltpu.CompilerParams(
        dimension_semantics=("parallel",),
        vmem_limit_bytes=vmem,
    )


# ----------------------- visual_hlayer (node features) -----------------------
def node_kernel(x_ref, w_ref, b_ref, o_ref):
    # Activation cast to bf16 in-kernel (VPU op hidden under DMA/MXU); weight is
    # already bf16; accumulate in f32 on the MXU.
    x = x_ref[...].astype(jnp.bfloat16)
    h = jnp.dot(x, w_ref[...], preferred_element_type=jnp.float32) + b_ref[...]
    # LeakyReLU(0.2); Dropout(0.8) is identity in eval mode.
    o_ref[...] = _leaky_relu(h)


def visual_hlayer(obj_fmap, w_bf16, b):
    n, d = obj_fmap.shape
    h = w_bf16.shape[1]
    tm = _choose_tile(n, MAX_ROW_TILE)
    blk_bytes = tm * d * 4 + d * h * 2 + h * 4 + tm * h * 4
    return pl.pallas_call(
        node_kernel,
        out_shape=jax.ShapeDtypeStruct((n, h), jnp.float32),
        grid=(pl.cdiv(n, tm),),
        in_specs=[
            pl.BlockSpec((tm, d), lambda i: (i, 0)),
            pl.BlockSpec((d, h), lambda i: (0, 0)),
            pl.BlockSpec((1, h), lambda i: (0, 0)),
        ],
        out_specs=pl.BlockSpec((tm, h), lambda i: (i, 0)),
        compiler_params=_compiler_params(blk_bytes),
    )(obj_fmap, w_bf16, b.reshape(1, h))


# -------- location feature + location_hlayer + ScaleLayer + edge_transform ---
def edge_kernel(boxes_ref, pair_ref, w1_ref, b1_ref, w2_ref, b2_ref, out_ref):
    tp = out_ref.shape[0]
    boxes = boxes_ref[...]                       # full [N, 4] = (x0, y0, x1, y1)
    n = boxes.shape[0]

    # center_size: (x0,y0,x1,y1) -> (cx,cy,w,h), w = x1-x0+1, cx = x0 + 0.5*(w-1)
    wh = boxes[:, 2:4] - boxes[:, 0:2] + 1.0
    cen = boxes[:, 0:2] + 0.5 * (wh - 1.0)
    cs = jnp.concatenate([cen, wh], axis=1)      # [N, 4] = (cx, cy, w, h)

    # In-kernel pair gather (replaces host-side jnp.take): exact one-hot matmul
    # against the full box table; avoids any dynamic-gather lowering.
    pair = pair_ref[...]                         # [tp, 2] int32 = (head, tail)
    col = jax.lax.broadcasted_iota(jnp.int32, (tp, n), 1)
    oh_h = (pair[:, 0:1] == col).astype(jnp.float32)
    oh_t = (pair[:, 1:2] == col).astype(jnp.float32)
    s_cs = jnp.dot(oh_h, cs, preferred_element_type=jnp.float32)   # [tp, 4]
    o_cs = jnp.dot(oh_t, cs, preferred_element_type=jnp.float32)

    s_c, s_wh = s_cs[:, 0:2], s_cs[:, 2:4]
    o_c, o_wh = o_cs[:, 0:2], o_cs[:, 2:4]
    # Valid boxes have w,h >= 1; the clamp only keeps the masked padding rows of
    # a partial last block finite (they never reach the stored output).
    s_wh = jnp.maximum(s_wh, 1e-12)
    o_wh = jnp.maximum(o_wh, 1e-12)

    # get_loc_features: scale-invariant pair geometry (8 columns as 4 [tp,2] pieces)
    t_coord_subj = (s_c - o_c) / o_wh
    t_size_subj = jnp.log(s_wh / o_wh)
    t_coord_obj = (o_c - s_c) / s_wh
    t_size_obj = jnp.log(o_wh / s_wh)

    # location_hlayer Linear(8 -> 20) as eight broadcast FMAs on the VPU
    # (column order matches torch.cat((tcs, tss, tco, tso), 1)); no tiny MXU pass.
    cols = (t_coord_subj[:, 0:1], t_coord_subj[:, 1:2],
            t_size_subj[:, 0:1], t_size_subj[:, 1:2],
            t_coord_obj[:, 0:1], t_coord_obj[:, 1:2],
            t_size_obj[:, 0:1], t_size_obj[:, 1:2])
    w1 = w1_ref[...]             # [8, 20]
    h1 = b1_ref[...]             # [1, 20], broadcasts up on first FMA
    for k, c in enumerate(cols):
        h1 = h1 + c * w1[k:k + 1, :]
    h1 = _leaky_relu(h1)         # Dropout(0.1) identity in eval mode.
    # ScaleLayer(1.0) is folded into w2 in the wrapper (commutes through the Linear).

    # edge_transform Linear(20 -> H): bf16 operands, f32 accumulation;
    # LeakyReLU(0.2) (Dropout(0.1) identity in eval).
    h2 = jnp.dot(h1.astype(jnp.bfloat16), w2_ref[...],
                 preferred_element_type=jnp.float32) + b2_ref[...]
    out_ref[...] = _leaky_relu(h2)


def edge_path(scale, boxes, pair_inds, w1, b1, w2, b2):
    p = pair_inds.shape[0]
    n = boxes.shape[0]
    h = w2.shape[1]
    tp = _choose_tile(p, MAX_PAIR_TILE)
    # ScaleLayer commutes through edge_transform's Linear: (s*h1) @ W2 == h1 @ (s*W2);
    # fold and cast the tiny [20, H] weight once per call (negligible).
    w2_s = (w2 * scale[0]).astype(jnp.bfloat16)
    blk_bytes = (n * 4 * 4 + tp * 2 * 4 + LOC_IN * LOC_DIM * 4 + LOC_DIM * 4
                 + LOC_DIM * h * 2 + h * 4 + tp * h * 4)
    return pl.pallas_call(
        edge_kernel,
        out_shape=jax.ShapeDtypeStruct((p, h), jnp.float32),
        grid=(pl.cdiv(p, tp),),
        in_specs=[
            pl.BlockSpec((n, 4), lambda i: (0, 0)),         # full box table every step
            pl.BlockSpec((tp, 2), lambda i: (i, 0)),        # packed (head, tail) indices
            pl.BlockSpec((LOC_IN, LOC_DIM), lambda i: (0, 0)),
            pl.BlockSpec((1, LOC_DIM), lambda i: (0, 0)),
            pl.BlockSpec((LOC_DIM, h), lambda i: (0, 0)),
            pl.BlockSpec((1, h), lambda i: (0, 0)),
        ],
        out_specs=pl.BlockSpec((tp, h), lambda i: (i, 0)),
        compiler_params=_compiler_params(blk_bytes),
    )(boxes, pair_inds, w1, b1.reshape(1, LOC_DIM), w2_s, b2.reshape(1, h))


# ----------------------------- parameter init --------------------------------
def xavier_init(key, fan_in, fan_out, gain):
    limit = gain * np.sqrt(6.0 / (fan_in + fan_out))
    return jax.random.uniform(key, (fan_in, fan_out), jnp.float32, -limit, limit)


def init_params(key):
    gain = float(np.sqrt(2.0 / (1.0 + NEG_SLOPE ** 2)))  # calculate_gain('leaky_relu', 0.2)
    k = jax.random.split(key, 3)
    return {
        # node weight stored bf16 once (no per-call cast)
        "w_vis": xavier_init(k[0], OBJ_DIM, HIDDEN_DIM, gain).astype(jnp.bfloat16),
        "b_vis": jnp.zeros((HIDDEN_DIM,), jnp.float32),
        "w_loc": xavier_init(k[1], LOC_IN, LOC_DIM, gain),
        "b_loc": jnp.zeros((LOC_DIM,), jnp.float32),
        "scale": jnp.array([1.0], jnp.float32),            # ScaleLayer(1.0)
        "w_edge": xavier_init(k[2], LOC_DIM, HIDDEN_DIM, gain),
        "b_edge": jnp.zeros((HIDDEN_DIM,), jnp.float32),
    }


# ------------------------------ model forward --------------------------------
def rel_model_forward(params, obj_fmap, boxes, head_inds, tail_inds):
    """Eval-mode node/edge feature path of RelModel.forward (use_union=False)."""
    node_features = visual_hlayer(obj_fmap, params["w_vis"], params["b_vis"])

    # Pair indices are packed into one [P,2] int32 operand; the box gather itself
    # happens inside the edge kernel (no host-side jnp.take / HBM round trip).
    pair_inds = jnp.stack([head_inds, tail_inds], axis=1).astype(jnp.int32)
    edge_features = edge_path(params["scale"], boxes, pair_inds,
                              params["w_loc"], params["b_loc"],
                              params["w_edge"], params["b_edge"])
    return node_features, edge_features


# -------------------------- pure-JAX reference -------------------------------
def _reference_forward(params, obj_fmap, boxes, head_inds, tail_inds):
    node = _leaky_relu(obj_fmap @ params["w_vis"].astype(jnp.float32) + params["b_vis"])
    wh = boxes[:, 2:4] - boxes[:, 0:2] + 1.0
    c = boxes[:, 0:2] + 0.5 * (wh - 1.0)
    sc, sw = c[head_inds], wh[head_inds]
    oc, ow = c[tail_inds], wh[tail_inds]
    loc = jnp.concatenate([(sc - oc) / ow, jnp.log(sw / ow),
                           (oc - sc) / sw, jnp.log(ow / sw)], axis=1)
    h1 = _leaky_relu(loc @ params["w_loc"] + params["b_loc"]) * params["scale"][0]
    edge = _leaky_relu(h1 @ params["w_edge"] + params["b_edge"])
    return node, edge


if __name__ == "__main__":
    key = jax.random.PRNGKey(0)
    k_param, k_fmap, k_box = jax.random.split(key, 3)

    params = init_params(k_param)

    # Synthetic detector outputs: 2 images x 4 objects = 8 ROIs.
    N = 8
    im_inds = np.array([0, 0, 0, 0, 1, 1, 1, 1], dtype=np.int32)
    obj_fmap = jax.random.normal(k_fmap, (N, OBJ_DIM), jnp.float32)

    kb0, kb1 = jax.random.split(k_box)
    xy0 = jax.random.uniform(kb0, (N, 2), jnp.float32, 0.0, 50.0)
    wh = jax.random.uniform(kb1, (N, 2), jnp.float32, 5.0, 30.0)
    boxes = jnp.concatenate([xy0, xy0 + wh], axis=1)  # (x0, y0, x1, y1)

    # Pair enumeration (is_cand with zeroed diagonal, nonzero) — glue, done host-side.
    is_cand = (im_inds[:, None] == im_inds[None]) & ~np.eye(N, dtype=bool)
    head_np, tail_np = np.nonzero(is_cand)
    head_inds = jnp.asarray(head_np, jnp.int32)
    tail_inds = jnp.asarray(tail_np, jnp.int32)

    node_features, edge_features = rel_model_forward(
        params, obj_fmap, boxes, head_inds, tail_inds)
    jax.block_until_ready((node_features, edge_features))

    ref_node, ref_edge = _reference_forward(params, obj_fmap, boxes, head_inds, tail_inds)

    assert node_features.shape == (N, HIDDEN_DIM)
    assert edge_features.shape == (head_inds.shape[0], HIDDEN_DIM)
    assert bool(jnp.all(jnp.isfinite(node_features)))
    assert bool(jnp.all(jnp.isfinite(edge_features)))
    # bf16 MXU operands (f32 accumulation) on both paths -> loose tolerances.
    assert bool(jnp.allclose(node_features, ref_node, rtol=5e-2, atol=5e-2))
    assert bool(jnp.allclose(edge_features, ref_edge, rtol=5e-2, atol=5e-2))
    print("KERNEL_OK")
</pallas_src>

<mosaic_0001>
module attributes {stable_mosaic.version = 11 : i64} {
  func.func @node_kernel(%arg0: i32, %arg1: memref<8x256xf32, #tpu.memory_space<vmem>>, %arg2: memref<256x256xbf16, #tpu.memory_space<vmem>>, %arg3: memref<1x256xf32, #tpu.memory_space<vmem>>, %arg4: memref<8x256xf32, #tpu.memory_space<vmem>>) attributes {dimension_semantics = [#tpu.dimension_semantics<parallel>], iteration_bounds = array<i64: 1>, scalar_prefetch = 0 : i64, scratch_operands = 0 : i64, tpu.core_type = #tpu.core_type<tc>, window_params = [{transform_indices = @transform_0, window_bounds = array<i64: 8, 256>}, {pipeline_mode = #tpu.pipeline_mode<synchronous>, transform_indices = @transform_1, window_bounds = array<i64: 256, 256>}, {pipeline_mode = #tpu.pipeline_mode<synchronous>, transform_indices = @transform_2, window_bounds = array<i64: 1, 256>}, {transform_indices = @transform_3, window_bounds = array<i64: 8, 256>}]} {
    %c0 = arith.constant 0 : index
    %c0_0 = arith.constant 0 : index
    %0 = vector.load %arg1[%c0, %c0_0] : memref<8x256xf32, #tpu.memory_space<vmem>>, vector<8x256xf32>
    %1 = arith.truncf %0 : vector<8x256xf32> to vector<8x256xbf16>
    %c0_1 = arith.constant 0 : index
    %c0_2 = arith.constant 0 : index
    %2 = vector.load %arg2[%c0_1, %c0_2] : memref<256x256xbf16, #tpu.memory_space<vmem>>, vector<256x256xbf16>
    %cst = arith.constant dense<0.000000e+00> : vector<8x256xf32>
    %3 = tpu.matmul %1, %2, %cst {dimension_numbers = #tpu.dot_dimension_numbers<[1], [0], [0], [1], [0, 0, 1, 1], [], []>} : vector<8x256xbf16>, vector<256x256xbf16>, vector<8x256xf32> -> vector<8x256xf32>
    %c0_3 = arith.constant 0 : index
    %c0_4 = arith.constant 0 : index
    %4 = vector.load %arg3[%c0_3, %c0_4] : memref<1x256xf32, #tpu.memory_space<vmem>>, vector<1x256xf32>
    %5 = vector.broadcast %4 : vector<1x256xf32> to vector<8x256xf32>
    %6 = arith.addf %3, %5 : vector<8x256xf32>
    %cst_5 = arith.constant 0.000000e+00 : f32
    %7 = vector.broadcast %cst_5 : f32 to vector<8x256xf32>
    %8 = arith.cmpf ogt, %6, %7 : vector<8x256xf32>
    %cst_6 = arith.constant 2.000000e-01 : f32
    %9 = vector.broadcast %cst_6 : f32 to vector<8x256xf32>
    %10 = arith.mulf %9, %6 : vector<8x256xf32>
    %11 = arith.select %8, %6, %10 : vector<8x256xi1>, vector<8x256xf32>
    %c0_7 = arith.constant 0 : index
    %c0_8 = arith.constant 0 : index
    %12 = vector.load %arg4[%c0_7, %c0_8] : memref<8x256xf32, #tpu.memory_space<vmem>>, vector<8x256xf32>
    tpu.vector_store %arg4[%c0_7, %c0_8], %11 {strides = array<i32>} : memref<8x256xf32, #tpu.memory_space<vmem>>, vector<8x256xf32>,
    return
  }
  func.func @transform_0(%arg0: i32) -> (i32, i32) {
    %c0_i32 = arith.constant 0 : i32
    %c0_i32_0 = arith.constant 0 : i32
    return %arg0, %c0_i32 : i32, i32
  }
  func.func @transform_1(%arg0: i32) -> (i32, i32) {
    %c0_i32 = arith.constant 0 : i32
    %c0_i32_0 = arith.constant 0 : i32
    %c0_i32_1 = arith.constant 0 : i32
    return %c0_i32, %c0_i32_0 : i32, i32
  }
  func.func @transform_2(%arg0: i32) -> (i32, i32) {
    %c0_i32 = arith.constant 0 : i32
    %c0_i32_0 = arith.constant 0 : i32
    %c0_i32_1 = arith.constant 0 : i32
    return %c0_i32, %c0_i32_0 : i32, i32
  }
  func.func @transform_3(%arg0: i32) -> (i32, i32) {
    %c0_i32 = arith.constant 0 : i32
    %c0_i32_0 = arith.constant 0 : i32
    return %arg0, %c0_i32 : i32, i32
  }
}

</mosaic_0001>

<bundles_post_ra>
// kernel: tpu_custom_call.1
= control target key start
LH: loop header
LB: loop body
LE: loop exit
PB: predicated region body
PF: predicated region fallthrough
CT: control target
= control target key end

     0   :  { %8 = vsyncpa [#allocation3], 0  ;;  %s542_s0 = inlined_call_operand.hbm [shape: f32[8,256], index: 0, kind: input, shape index: {}]   ;;  %s543_s1 = inlined_call_operand.hbm [shape: bf16[256,256], index: 1, kind: input, shape index: {}]   ;;  %s544_s2 = inlined_call_operand.vmem [shape: f32[1,256], index: 2, kind: input, shape index: {}]   ;;  %s545_s3 = inlined_call_operand.hbm [shape: f32[8,256], index: 3, kind: output, shape index: {}]  }
   0x1   :  { %9 = vsyncpa [#allocation6], 0 }
   0x2   :  { %10 = vsyncpa [#allocation4], 0  ;;  %s471_s12 = smov [#allocation2]   ;;  %s472_s14 = smov [#allocation5]  }
   0x3   :  { %s17_s13 = sshll.u32 %s471_s12, 4  ;;  %s26_s15 = sshll.u32 %s472_s14, 4  ;;  %s18_s13 = int_to_ptr.vmem [resolvable:$true] %s17_s13  ;;  %s496_s15 = int_to_ptr.vmem [resolvable:$true] %s26_s15 }
   0x4   :  { %s399_s18 = scalar_lea.hbm %s542_s0, 256 }
   0x5   :  { %p400_p0 = scmp.ne.s32.totalorder %s542_s0, %s399_s18  ;;  %p403_p1 = scmp.lt.u32.totalorder %s399_s18, %s542_s0 }
   0x7   :  { %p405_p2 = pnand %p403_p1, %p400_p0 }
   0x9   :  { %408 = shalt.err (!%p405_p2)
}
   0xa   :  { %s409_s23 = scalar_lea.vmem %s18_s13, 256  ;;  %p414_p4 = scmp.lt.s32.totalorder %s18_s13, %s18_s13 }
   0xb   :  { %p410_p3 = scmp.ne.s32.totalorder %s18_s13, %s409_s23  ;;  %p415_p5 = scmp.lt.s32.totalorder %s409_s23, %s409_s23 }
   0xd   :  { %p416_p6 = por %p415_p5, %p414_p4 }
   0xf   :  { %p417_p7 = pnand %p416_p6, %p410_p3 }
  0x11   :  { %420 = shalt.err (!%p417_p7)
}
  0x12   :  { %20 = dma.hbm_to_vmem [thread:$0]  %s542_s0, 256, %s18_s13, [#allocation3]  }
  0x13   :  { %s421_s28 = scalar_lea.hbm %s543_s1, 4096 }
  0x14   :  { %p422_p8 = scmp.ne.s32.totalorder %s543_s1, %s421_s28  ;;  %p425_p9 = scmp.lt.u32.totalorder %s421_s28, %s543_s1 }
  0x16   :  { %p427_p10 = pnand %p425_p9, %p422_p8 }
  0x18   :  { %430 = shalt.err (!%p427_p10)
}
  0x19   :  { %s431_s6 = scalar_lea.vmem %s496_s15, 4096  ;;  %p436_p12 = scmp.lt.s32.totalorder %s496_s15, %s496_s15 }
  0x1a   :  { %p432_p11 = scmp.ne.s32.totalorder %s496_s15, %s431_s6  ;;  %p437_p13 = scmp.lt.s32.totalorder %s431_s6, %s431_s6 }
  0x1c   :  { %p438_p0 = por %p437_p13, %p436_p12 }
  0x1e   :  { %p439_p1 = pnand %p438_p0, %p432_p11 }
  0x20   :  { %442 = shalt.err (!%p439_p1)
}
  0x21   :  { %s473_s0 = smov 128   ;;  %s474_s7 = smov 8  }
  0x22   :  { %32 = dma.hbm_to_vmem [thread:$0]  %s543_s1, 4096, %s496_s15, [#allocation6], %s473_s0, %s473_s0, %s474_s7  }
  0x23   :  { %465 = dma.done.wait [#allocation3], 256  }
  0x24   :  { %466 = vsyncadd [#allocation3], 4294967040 }
  0x25   :  { %467 = dma.done.wait [#allocation6], 4096  }
  0x26   :  { %468 = vsyncadd [#allocation6], 4294963200  ;;  %v351_v0 = vld [vmem:[#allocation5 + $0x4] ss:$8 sps:$4 sm:$0xff]   ;;  %v353_v1 = vld [vmem:[#allocation5] ss:$8 sps:$4 sm:$0xff]   ;;  %v79_v36 = vlaneseq }
  0x27   :  { %249 = vmatprep.subr.bf16.mxu0 %v351_v0  ;;  %v354_v2 = vld [vmem:[#allocation5 + $0x14] ss:$8 sps:$4 sm:$0xff]   ;;  %v356_v3 = vld [vmem:[#allocation5 + $0x10] ss:$8 sps:$4 sm:$0xff]   ;;  %v357_v4 = vld [vmem:[#allocation5 + $0x24] ss:$8 sps:$4 sm:$0xff]  }
  0x28   :  { %250 = vmatpush1.bf16.msra.mxu0 %v353_v1  ;;  %v359_v5 = vld [vmem:[#allocation5 + $0x20] ss:$8 sps:$4 sm:$0xff]   ;;  %v360_v6 = vld [vmem:[#allocation5 + $0x34] ss:$8 sps:$4 sm:$0xff]   ;;  %v362_v7 = vld [vmem:[#allocation5 + $0x30] ss:$8 sps:$4 sm:$0xff]  }
  0x29   :  { %251 = vmatprep.subr.bf16.mxu0 %v354_v2  ;;  %v363_v8 = vld [vmem:[#allocation5 + $0x44] ss:$8 sps:$4 sm:$0xff]   ;;  %v365_v9 = vld [vmem:[#allocation5 + $0x40] ss:$8 sps:$4 sm:$0xff]   ;;  %v366_v10 = vld [vmem:[#allocation5 + $0x54] ss:$8 sps:$4 sm:$0xff]  }
  0x2a   :  { %v368_v11 = vld [vmem:[#allocation5 + $0x50] ss:$8 sps:$4 sm:$0xff]   ;;  %v369_v12 = vld [vmem:[#allocation5 + $0x64] ss:$8 sps:$4 sm:$0xff]   ;;  %v371_v15 = vld [vmem:[#allocation5 + $0x60] ss:$8 sps:$4 sm:$0xff]  }
  0x2b   :  { %v42_v13 = vld [vmem:[#allocation2 + $0x8] sm:$0xff]  ;;  %v375_v18 = vld [vmem:[#allocation5 + $0x84] ss:$8 sps:$4 sm:$0xff]   ;;  %v377_v19 = vld [vmem:[#allocation5 + $0x80] ss:$8 sps:$4 sm:$0xff]   ;;  %v80_v37 = vshrl.u32 %v79_v36, 7 }
  0x2c   :  { %252 = vmatpush1.bf16.msra.mxu0 %v356_v3  ;;  %v44_v14 = vpack.c.bf16 %v42_v13, %v42_v13  ;;  %v372_v16 = vld [vmem:[#allocation5 + $0x74] ss:$8 sps:$4 sm:$0xff]   ;;  %v374_v17 = vld [vmem:[#allocation5 + $0x70] ss:$8 sps:$4 sm:$0xff]   ;;  %v381_v22 = vld [vmem:[#allocation5 + $0xa4] ss:$8 sps:$4 sm:$0xff]  }
  0x2d   :  { %253 = vmatprep.subr.bf16.mxu0 %v357_v4  ;;  %v378_v20 = vld [vmem:[#allocation5 + $0x94] ss:$8 sps:$4 sm:$0xff]   ;;  %v380_v21 = vld [vmem:[#allocation5 + $0x90] ss:$8 sps:$4 sm:$0xff]   ;;  %v383_v23 = vld [vmem:[#allocation5 + $0xa0] ss:$8 sps:$4 sm:$0xff]  }
  0x2e   :  { %281 = vmatprep.mubr.bf16.mxu0 %v44_v14  ;;  %v384_v24 = vld [vmem:[#allocation5 + $0xb4] ss:$8 sps:$4 sm:$0xff]   ;;  %v386_v25 = vld [vmem:[#allocation5 + $0xb0] ss:$8 sps:$4 sm:$0xff]   ;;  %v387_v26 = vld [vmem:[#allocation5 + $0xc4] ss:$8 sps:$4 sm:$0xff]  }
  0x2f   :  { %v389_v27 = vld [vmem:[#allocation5 + $0xc0] ss:$8 sps:$4 sm:$0xff]   ;;  %v390_v28 = vld [vmem:[#allocation5 + $0xd4] ss:$8 sps:$4 sm:$0xff]   ;;  %v392_v29 = vld [vmem:[#allocation5 + $0xd0] ss:$8 sps:$4 sm:$0xff]  }
  0x30   :  { %254 = vmatpush1.bf16.msra.mxu0 %v359_v5  ;;  %v393_v30 = vld [vmem:[#allocation5 + $0xe4] ss:$8 sps:$4 sm:$0xff]   ;;  %v395_v31 = vld [vmem:[#allocation5 + $0xe0] ss:$8 sps:$4 sm:$0xff]   ;;  %v396_v32 = vld [vmem:[#allocation5 + $0xf4] ss:$8 sps:$4 sm:$0xff]  }
  0x31   :  { %255 = vmatprep.subr.bf16.mxu0 %v360_v6  ;;  %v398_v33 = vld [vmem:[#allocation5 + $0xf0] ss:$8 sps:$4 sm:$0xff]   ;;  %v81_v38 = vsub.s32 0, %v80_v37  ;;  %v85_v40 = vsub.s32 1, %v80_v37  ;;  %s475_s11 = smov [#allocation7]  }
  0x32   :  { %v41_v34 = vld [vmem:[#allocation2] sm:$0xff]  ;;  %s304_s12 = sshll.u32 %s475_s11, 4  ;;  %s305_s12 = int_to_ptr.vmem [resolvable:$true] %s304_s12 }
  0x33   :  { %v43_v35 = vpack.c.bf16 %v41_v34, %v41_v34  ;;  %v77_v39 = vld [vmem:[%s544_s2] sm:$0x3]  ;;  %s443_s2 = scalar_lea.vmem %s305_s12, 256  ;;  %p448_p3 = scmp.lt.s32.totalorder %s305_s12, %s305_s12 }
  0x34   :  { %256 = vmatpush1.bf16.msra.mxu0 %v362_v7  ;;  %v82_v41 = vrot.slane %v77_v39, %v81_v38  ;;  %v86_v42 = vrot.slane %v77_v39, %v85_v40  ;;  %p444_p2 = scmp.ne.s32.totalorder %s305_s12, %s443_s2  ;;  %p449_p4 = scmp.lt.s32.totalorder %s443_s2, %s443_s2 }
  0x35   :  { %257 = vmatprep.subr.bf16.mxu0 %v363_v8 }
  0x36   :  { %p450_p5 = por %p449_p4, %p448_p3 }
  0x38   :  { %258 = vmatpush1.bf16.msra.mxu0 %v365_v9  ;;  %p451_p6 = pnand %p450_p5, %p444_p2 }
  0x39   :  { %259 = vmatprep.subr.bf16.mxu0 %v366_v10 }
  0x3c   :  { %260 = vmatpush1.bf16.msra.mxu0 %v368_v11 }
  0x3d   :  { %261 = vmatprep.subr.bf16.mxu0 %v369_v12 }
  0x40   :  { %262 = vmatpush1.bf16.msra.mxu0 %v371_v15 }
  0x41   :  { %263 = vmatprep.subr.bf16.mxu0 %v372_v16 }
  0x44   :  { %264 = vmatpush1.bf16.msra.mxu0 %v374_v17 }
  0x45   :  { %265 = vmatprep.subr.bf16.mxu0 %v375_v18 }
  0x48   :  { %266 = vmatpush1.bf16.msra.mxu0 %v377_v19 }
  0x49   :  { %267 = vmatprep.subr.bf16.mxu0 %v378_v20 }
  0x4c   :  { %268 = vmatpush1.bf16.msra.mxu0 %v380_v21 }
  0x4d   :  { %269 = vmatprep.subr.bf16.mxu0 %v381_v22 }
  0x50   :  { %270 = vmatpush1.bf16.msra.mxu0 %v383_v23 }
  0x51   :  { %271 = vmatprep.subr.bf16.mxu0 %v384_v24 }
  0x54   :  { %272 = vmatpush1.bf16.msra.mxu0 %v386_v25 }
  0x55   :  { %273 = vmatprep.subr.bf16.mxu0 %v387_v26 }
  0x58   :  { %274 = vmatpush1.bf16.msra.mxu0 %v389_v27 }
  0x59   :  { %275 = vmatprep.subr.bf16.mxu0 %v390_v28 }
  0x5c   :  { %276 = vmatpush1.bf16.msra.mxu0 %v392_v29 }
  0x5d   :  { %277 = vmatprep.subr.bf16.mxu0 %v393_v30 }
  0x60   :  { %278 = vmatpush1.bf16.msra.mxu0 %v395_v31 }
  0x61   :  { %279 = vmatprep.subr.bf16.mxu0 %v396_v32 }
  0x64   :  { %280 = vmatpush1.bf16.msra.mxu0 %v398_v33 }
  0x67   :  { %282 = vmatmul.mubr.bf16.vlgmr.msra.gmra.mrb[0].mxu0 %v43_v35 }
 0x13a   :  { %v283_v43 = vpop.f32.mrb[0].mxu0 }
 0x13b   :  { %v284_v44 = vadd.f32 %v283_v43, %v82_v41  ;;  %v285_v45 = vpop.f32.mrb[1].mxu0 }
 0x13c   :  { %v286_v46 = vadd.f32 %v285_v45, %v86_v42  ;;  %v287_v47 = vpop.f32.mrb[2].mxu0 }
 0x13d   :  { %vm290_vm0 = vcmp.gt.f32.partialorder %v284_v44, 0.0  ;;  %v292_v48 = vmul.f32 0.2, %v284_v44  ;;  %v288_v49 = vpop.f32.mrb[3].mxu0 }
 0x13e   :  { %vm291_vm1 = vcmp.gt.f32.partialorder %v286_v46, 0.0  ;;  %v293_v50 = vmul.f32 0.2, %v286_v46 }
 0x13f   :  { %v294_v51 = vsel %vm290_vm0, %v284_v44, %v292_v48 }
 0x140   :  { %v295_v52 = vsel %vm291_vm1, %v286_v46, %v293_v50  ;;  %296 = vst [vmem:[#allocation7] sm:$0xff] %v294_v51 }
 0x141   :  { %297 = vst [vmem:[#allocation7 + $0x8] sm:$0xff] %v295_v52 }
 0x142   :  { %454 = shalt.err (!%p451_p6)
}
 0x143   :  { %s455_s15 = scalar_lea.hbm %s545_s3, 256 }
 0x144   :  { %p456_p7 = scmp.ne.s32.totalorder %s545_s3, %s455_s15  ;;  %p459_p8 = scmp.lt.u32.totalorder %s455_s15, %s545_s3 }
 0x146   :  { %p461_p9 = pnand %p459_p8, %p456_p7 }
 0x148   :  { %464 = shalt.err (!%p461_p9)
}
 0x149   :  { %307 = dma.vmem_to_hbm [thread:$0]  %s305_s12, 256, %s545_s3, [#allocation4]  }
 0x14a   :  { %469 = dma.done.wait [#allocation4], 256  }
 0x14b   :  { %470 = vsyncadd [#allocation4], 4294967040 }
 0x14c   :  { %311 = vsyncpa [#allocation3], 1 }
 0x14d   :  { %312 = vsyncpa [#allocation6], 1 }
 0x14e   :  { %313 = vsyncpa [#allocation4], 1 }

</bundles_post_ra>
